<compile_context>
chip_gen: v7x
topology: tpu7x:2x2x1
jax: 0.10.0
libtpu: 0.0.40
codegen_flags: <defaults>
</compile_context>

<pallas_src>
import functools

import jax
import jax.numpy as jnp
from jax.experimental import pallas as pl
from jax.experimental.pallas import tpu as pltpu


def _round_up(x, m):
    return (x + m - 1) // m * m


def _num_tensorcores():
    """TensorCores per chip reachable by one pallas_call (v7x / megacore = 2)."""
    try:
        kind = jax.devices()[0].device_kind.lower()
    except Exception:
        return 1
    return 2 if any(t in kind for t in ("v7", "v5p", "v4")) else 1


def _mlp_kernel(x_ref, w1_ref, b1_ref, w2_ref, b2_ref, w3_ref, b3_ref, o_ref):
    """Fused 3-layer MLP on one batch tile.

    Activations are cast in-kernel to the weight (MXU operand) dtype; matmuls
    accumulate in f32 via preferred_element_type; bias add / ReLU stay in f32
    on the VPU (v5e has no bf16 VALUs); intermediates are cast back down only
    where they feed the next MXU matmul.
    """
    x = x_ref[...].astype(w1_ref.dtype)

    h1 = jnp.dot(x, w1_ref[...], preferred_element_type=jnp.float32) + b1_ref[...]
    h1 = jnp.maximum(h1, 0.0).astype(w2_ref.dtype)

    h2 = jnp.dot(h1, w2_ref[...], preferred_element_type=jnp.float32) + b2_ref[...]
    h2 = jnp.maximum(h2, 0.0).astype(w3_ref.dtype)

    y = jnp.dot(h2, w3_ref[...], preferred_element_type=jnp.float32) + b3_ref[...]
    o_ref[...] = y.astype(o_ref.dtype)


def prepare_params(w1, b1, w2, b2, w3, b3, *, matmul_dtype=jnp.bfloat16):
    """One-time parameter prep (call once, reuse the result for every forward).

    Weights -> matmul_dtype (bf16 = full-rate MXU operands; pass jnp.float32
    here for exact f32 parity with the PyTorch module).  Biases -> f32 with
    shape (1, out) so they broadcast over the batch tile inside the kernel.
    """
    f32 = jnp.float32
    return (w1.astype(matmul_dtype), jnp.reshape(b1, (1, -1)).astype(f32),
            w2.astype(matmul_dtype), jnp.reshape(b2, (1, -1)).astype(f32),
            w3.astype(matmul_dtype), jnp.reshape(b3, (1, -1)).astype(f32))


@functools.partial(jax.jit, static_argnames=("tile_b", "num_cores"))
def qlearning_forward(x, w1, b1, w2, b2, w3, b3, *, tile_b=1024, num_cores=1):
    """x: (batch, state_size) f32; weights (in, out); biases (1, out) f32."""
    batch, state = x.shape
    hidden = w1.shape[1]
    action = w3.shape[1]

    # --- Batch-tile / grid sizing --------------------------------------------
    num_tiles = pl.cdiv(batch, tile_b)
    if num_cores > 1 and batch >= 256:
        # "parallel" only shards across TensorCores if there are >= 2 steps.
        num_tiles = max(num_tiles, num_cores)
    # Round tiles to 16 rows (bf16 sublane packing), never past the batch
    # rounded to the 8-row f32 sublane tile -> <=15 dead rows total.
    tb = min(_round_up(pl.cdiv(batch, num_tiles), 16), _round_up(batch, 8))
    grid = (pl.cdiv(batch, tb),)

    # --- VMEM budget / weight buffering --------------------------------------
    w_bytes = (state * hidden + hidden * hidden + hidden * action) * w1.dtype.itemsize
    b_bytes = (2 * hidden + action) * 4
    # Constant-index weights still get 2 pipeline buffers by default; drop to a
    # single buffer once the double-buffered footprint gets large (guards v7x's
    # 64 MiB VMEM and the 32 MiB default scoped limit if hidden_size scales up).
    single_buffer_weights = 2 * (w_bytes + b_bytes) > (16 << 20)
    w_bufs = 1 if single_buffer_weights else 2
    est_vmem = (w_bufs * (w_bytes + b_bytes)
                + 2 * tb * state * x.dtype.itemsize   # x tiles (double-buffered)
                + 2 * tb * action * 4                 # output tiles
                + 4 * tb * hidden * 4)                # f32 intermediates headroom
    vmem_limit = None
    if est_vmem > (32 << 20):                         # above the default scoped limit
        vmem_limit = int(min(max(est_vmem * 3 // 2, 32 << 20), 64 << 20))

    def w_spec(shape):
        # Constant index_map -> fetched once, VMEM-resident across grid steps.
        if single_buffer_weights:
            return pl.BlockSpec(shape, lambda i: (0, 0), pipeline_mode=pl.Buffered(1))
        return pl.BlockSpec(shape, lambda i: (0, 0))

    return pl.pallas_call(
        _mlp_kernel,
        out_shape=jax.ShapeDtypeStruct((batch, action), jnp.float32),
        grid=grid,
        in_specs=[
            pl.BlockSpec((tb, state), lambda i: (i, 0)),   # x batch tile, true width
            w_spec((state, hidden)),                       # w1
            w_spec((1, hidden)),                           # b1
            w_spec((hidden, hidden)),                      # w2
            w_spec((1, hidden)),                           # b2
            w_spec((hidden, action)),                      # w3
            w_spec((1, action)),                           # b3
        ],
        out_specs=pl.BlockSpec((tb, action), lambda i: (i, 0)),  # true-width output
        compiler_params=pltpu.CompilerParams(
            dimension_semantics=("parallel",),
            vmem_limit_bytes=vmem_limit,
        ),
    )(x, w1, b1, w2, b2, w3, b3)


def init_params(key, state_size, hidden_size, action_size, dtype=jnp.float32):
    """Matches PyTorch nn.Linear default init: U(-1/sqrt(fan_in), 1/sqrt(fan_in)).
    Weights are stored transposed: (in_features, out_features)."""
    def linear(k, fan_in, fan_out):
        kw, kb = jax.random.split(k)
        bound = 1.0 / jnp.sqrt(fan_in)
        w = jax.random.uniform(kw, (fan_in, fan_out), dtype, -bound, bound)
        b = jax.random.uniform(kb, (1, fan_out), dtype, -bound, bound)
        return w, b

    k1, k2, k3 = jax.random.split(key, 3)
    w1, b1 = linear(k1, state_size, hidden_size)
    w2, b2 = linear(k2, hidden_size, hidden_size)
    w3, b3 = linear(k3, hidden_size, action_size)
    return w1, b1, w2, b2, w3, b3


if __name__ == "__main__":
    # Small shapes consistent with the module: (batch, state) -> (batch, action).
    batch, state_size, hidden_size, action_size = 8, 16, 64, 4

    key = jax.random.PRNGKey(0)
    k_x, k_p = jax.random.split(key)

    x = jax.random.normal(k_x, (batch, state_size), dtype=jnp.float32)
    raw_params = init_params(k_p, state_size, hidden_size, action_size)

    # Prepared once and reused for every forward call (no per-call casts/pads).
    params = prepare_params(*raw_params)
    num_cores = _num_tensorcores()

    out = qlearning_forward(x, *params, num_cores=num_cores)
    out = jax.block_until_ready(out)
    assert out.shape == (batch, action_size)
    assert out.dtype == jnp.float32

    w1, b1, w2, b2, w3, b3 = raw_params
    bf = jnp.bfloat16

    # Reference with the same bf16-operand / f32-accumulate recipe (tight tol).
    h1 = jnp.maximum(
        jnp.dot(x.astype(bf), w1.astype(bf), preferred_element_type=jnp.float32) + b1, 0.0)
    h2 = jnp.maximum(
        jnp.dot(h1.astype(bf), w2.astype(bf), preferred_element_type=jnp.float32) + b2, 0.0)
    ref_bf = jnp.dot(h2.astype(bf), w3.astype(bf), preferred_element_type=jnp.float32) + b3
    assert jnp.allclose(out, ref_bf, atol=2e-3, rtol=2e-3)

    # Full-f32 reference of the original module semantics (loose tol, bf16 operands).
    # For exact f32 parity, use prepare_params(..., matmul_dtype=jnp.float32).
    ref_f32 = jnp.maximum(x @ w1 + b1, 0.0)
    ref_f32 = jnp.maximum(ref_f32 @ w2 + b2, 0.0)
    ref_f32 = ref_f32 @ w3 + b3
    assert jnp.allclose(out, ref_f32, atol=5e-2, rtol=5e-2)

    print("KERNEL_OK")
</pallas_src>

<mosaic_0001>
module attributes {stable_mosaic.version = 11 : i64} {
  func.func @_mlp_kernel(%arg0: i32, %arg1: memref<8x16xf32, #tpu.memory_space<vmem>>, %arg2: memref<16x64xbf16, #tpu.memory_space<vmem>>, %arg3: memref<1x64xf32, #tpu.memory_space<vmem>>, %arg4: memref<64x64xbf16, #tpu.memory_space<vmem>>, %arg5: memref<1x64xf32, #tpu.memory_space<vmem>>, %arg6: memref<64x4xbf16, #tpu.memory_space<vmem>>, %arg7: memref<1x4xf32, #tpu.memory_space<vmem>>, %arg8: memref<8x4xf32, #tpu.memory_space<vmem>>) attributes {dimension_semantics = [#tpu.dimension_semantics<parallel>], iteration_bounds = array<i64: 1>, scalar_prefetch = 0 : i64, scratch_operands = 0 : i64, tpu.core_type = #tpu.core_type<tc>, window_params = [{transform_indices = @transform_0, window_bounds = array<i64: 8, 16>}, {pipeline_mode = #tpu.pipeline_mode<synchronous>, transform_indices = @transform_1, window_bounds = array<i64: 16, 64>}, {pipeline_mode = #tpu.pipeline_mode<synchronous>, transform_indices = @transform_2, window_bounds = array<i64: 1, 64>}, {pipeline_mode = #tpu.pipeline_mode<synchronous>, transform_indices = @transform_3, window_bounds = array<i64: 64, 64>}, {pipeline_mode = #tpu.pipeline_mode<synchronous>, transform_indices = @transform_4, window_bounds = array<i64: 1, 64>}, {pipeline_mode = #tpu.pipeline_mode<synchronous>, transform_indices = @transform_5, window_bounds = array<i64: 64, 4>}, {pipeline_mode = #tpu.pipeline_mode<synchronous>, transform_indices = @transform_6, window_bounds = array<i64: 1, 4>}, {transform_indices = @transform_7, window_bounds = array<i64: 8, 4>}]} {
    %c0 = arith.constant 0 : index
    %c0_0 = arith.constant 0 : index
    %0 = vector.load %arg1[%c0, %c0_0] : memref<8x16xf32, #tpu.memory_space<vmem>>, vector<8x16xf32>
    %1 = arith.truncf %0 : vector<8x16xf32> to vector<8x16xbf16>
    %c0_1 = arith.constant 0 : index
    %c0_2 = arith.constant 0 : index
    %2 = vector.load %arg2[%c0_1, %c0_2] : memref<16x64xbf16, #tpu.memory_space<vmem>>, vector<16x64xbf16>
    %cst = arith.constant dense<0.000000e+00> : vector<8x64xf32>
    %3 = tpu.matmul %1, %2, %cst {dimension_numbers = #tpu.dot_dimension_numbers<[1], [0], [0], [1], [0, 0, 1, 1], [], []>} : vector<8x16xbf16>, vector<16x64xbf16>, vector<8x64xf32> -> vector<8x64xf32>
    %c0_3 = arith.constant 0 : index
    %c0_4 = arith.constant 0 : index
    %4 = vector.load %arg3[%c0_3, %c0_4] : memref<1x64xf32, #tpu.memory_space<vmem>>, vector<1x64xf32>
    %5 = vector.broadcast %4 : vector<1x64xf32> to vector<8x64xf32>
    %6 = arith.addf %3, %5 : vector<8x64xf32>
    %cst_5 = arith.constant 0.000000e+00 : f32
    %7 = vector.broadcast %cst_5 : f32 to vector<8x64xf32>
    %8 = arith.maximumf %6, %7 : vector<8x64xf32>
    %9 = arith.truncf %8 : vector<8x64xf32> to vector<8x64xbf16>
    %c0_6 = arith.constant 0 : index
    %c0_7 = arith.constant 0 : index
    %10 = vector.load %arg4[%c0_6, %c0_7] : memref<64x64xbf16, #tpu.memory_space<vmem>>, vector<64x64xbf16>
    %cst_8 = arith.constant dense<0.000000e+00> : vector<8x64xf32>
    %11 = tpu.matmul %9, %10, %cst_8 {dimension_numbers = #tpu.dot_dimension_numbers<[1], [0], [0], [1], [0, 0, 1, 1], [], []>} : vector<8x64xbf16>, vector<64x64xbf16>, vector<8x64xf32> -> vector<8x64xf32>
    %c0_9 = arith.constant 0 : index
    %c0_10 = arith.constant 0 : index
    %12 = vector.load %arg5[%c0_9, %c0_10] : memref<1x64xf32, #tpu.memory_space<vmem>>, vector<1x64xf32>
    %13 = vector.broadcast %12 : vector<1x64xf32> to vector<8x64xf32>
    %14 = arith.addf %11, %13 : vector<8x64xf32>
    %cst_11 = arith.constant 0.000000e+00 : f32
    %15 = vector.broadcast %cst_11 : f32 to vector<8x64xf32>
    %16 = arith.maximumf %14, %15 : vector<8x64xf32>
    %17 = arith.truncf %16 : vector<8x64xf32> to vector<8x64xbf16>
    %c0_12 = arith.constant 0 : index
    %c0_13 = arith.constant 0 : index
    %18 = vector.load %arg6[%c0_12, %c0_13] : memref<64x4xbf16, #tpu.memory_space<vmem>>, vector<64x4xbf16>
    %cst_14 = arith.constant dense<0.000000e+00> : vector<8x4xf32>
    %19 = tpu.matmul %17, %18, %cst_14 {dimension_numbers = #tpu.dot_dimension_numbers<[1], [0], [0], [1], [0, 0, 1, 1], [], []>} : vector<8x64xbf16>, vector<64x4xbf16>, vector<8x4xf32> -> vector<8x4xf32>
    %c0_15 = arith.constant 0 : index
    %c0_16 = arith.constant 0 : index
    %20 = vector.load %arg7[%c0_15, %c0_16] : memref<1x4xf32, #tpu.memory_space<vmem>>, vector<1x4xf32>
    %21 = vector.broadcast %20 : vector<1x4xf32> to vector<8x4xf32>
    %22 = arith.addf %19, %21 : vector<8x4xf32>
    %c0_17 = arith.constant 0 : index
    %c0_18 = arith.constant 0 : index
    %23 = vector.load %arg8[%c0_17, %c0_18] : memref<8x4xf32, #tpu.memory_space<vmem>>, vector<8x4xf32>
    tpu.vector_store %arg8[%c0_17, %c0_18], %22 {strides = array<i32>} : memref<8x4xf32, #tpu.memory_space<vmem>>, vector<8x4xf32>,
    return
  }
  func.func @transform_0(%arg0: i32) -> (i32, i32) {
    %c0_i32 = arith.constant 0 : i32
    %c0_i32_0 = arith.constant 0 : i32
    return %arg0, %c0_i32 : i32, i32
  }
  func.func @transform_1(%arg0: i32) -> (i32, i32) {
    %c0_i32 = arith.constant 0 : i32
    %c0_i32_0 = arith.constant 0 : i32
    %c0_i32_1 = arith.constant 0 : i32
    return %c0_i32, %c0_i32_0 : i32, i32
  }
  func.func @transform_2(%arg0: i32) -> (i32, i32) {
    %c0_i32 = arith.constant 0 : i32
    %c0_i32_0 = arith.constant 0 : i32
    %c0_i32_1 = arith.constant 0 : i32
    return %c0_i32, %c0_i32_0 : i32, i32
  }
  func.func @transform_3(%arg0: i32) -> (i32, i32) {
    %c0_i32 = arith.constant 0 : i32
    %c0_i32_0 = arith.constant 0 : i32
    %c0_i32_1 = arith.constant 0 : i32
    return %c0_i32, %c0_i32_0 : i32, i32
  }
  func.func @transform_4(%arg0: i32) -> (i32, i32) {
    %c0_i32 = arith.constant 0 : i32
    %c0_i32_0 = arith.constant 0 : i32
    %c0_i32_1 = arith.constant 0 : i32
    return %c0_i32, %c0_i32_0 : i32, i32
  }
  func.func @transform_5(%arg0: i32) -> (i32, i32) {
    %c0_i32 = arith.constant 0 : i32
    %c0_i32_0 = arith.constant 0 : i32
    %c0_i32_1 = arith.constant 0 : i32
    return %c0_i32, %c0_i32_0 : i32, i32
  }
  func.func @transform_6(%arg0: i32) -> (i32, i32) {
    %c0_i32 = arith.constant 0 : i32
    %c0_i32_0 = arith.constant 0 : i32
    %c0_i32_1 = arith.constant 0 : i32
    return %c0_i32, %c0_i32_0 : i32, i32
  }
  func.func @transform_7(%arg0: i32) -> (i32, i32) {
    %c0_i32 = arith.constant 0 : i32
    %c0_i32_0 = arith.constant 0 : i32
    return %arg0, %c0_i32 : i32, i32
  }
}

</mosaic_0001>

<bundles_post_ra>
// kernel: qlearning_forward.1
= control target key start
LH: loop header
LB: loop body
LE: loop exit
PB: predicated region body
PF: predicated region fallthrough
CT: control target
= control target key end

     0   :  { %12 = vsyncpa [#allocation3], 0  ;;  %s373_s24 = smov [#allocation2]   ;;  %s471_s0 = inlined_call_operand.vmem [shape: f32[8,16], index: 0, kind: input, shape index: {}]   ;;  %s472_s1 = inlined_call_operand.hbm [shape: bf16[16,64], index: 1, kind: input, shape index: {}]   ;;  %s473_s2 = inlined_call_operand.vmem [shape: f32[1,64], index: 2, kind: input, shape index: {}]   ;;  %s474_s3 = inlined_call_operand.vmem [shape: bf16[64,64], index: 3, kind: input, shape index: {}]   ;;  %s475_s4 = inlined_call_operand.vmem [shape: f32[1,64], index: 4, kind: input, shape index: {}]   ;;  %s476_s5 = inlined_call_operand.vmem [shape: bf16[64,4], index: 5, kind: input, shape index: {}]   ;;  %s477_s6 = inlined_call_operand.vmem [shape: f32[1,4], index: 6, kind: input, shape index: {}]   ;;  %s478_s7 = inlined_call_operand.vmem [shape: f32[8,4], index: 7, kind: output, shape index: {}]  }
   0x1   :  { %s20_s25 = sshll.u32 %s373_s24, 4  ;;  %s349_s28 = scalar_lea.hbm %s472_s1, 128  ;;  %s21_s25 = int_to_ptr.vmem [resolvable:$true] %s20_s25 }
   0x2   :  { %p350_p0 = scmp.ne.s32.totalorder %s472_s1, %s349_s28  ;;  %p353_p1 = scmp.lt.u32.totalorder %s349_s28, %s472_s1 }
   0x4   :  { %p355_p2 = pnand %p353_p1, %p350_p0 }
   0x6   :  { %358 = shalt.err (!%p355_p2)
}
   0x7   :  { %s359_s10 = scalar_lea.vmem %s21_s25, 128  ;;  %p364_p4 = scmp.lt.s32.totalorder %s21_s25, %s21_s25 }
   0x8   :  { %p360_p3 = scmp.ne.s32.totalorder %s21_s25, %s359_s10  ;;  %p365_p5 = scmp.lt.s32.totalorder %s359_s10, %s359_s10 }
   0xa   :  { %p366_p6 = por %p365_p5, %p364_p4 }
   0xc   :  { %p367_p7 = pnand %p366_p6, %p360_p3 }
   0xe   :  { %370 = shalt.err (!%p367_p7)
}
   0xf   :  { %s374_s11 = smov 64   ;;  %s375_s12 = smov 4  }
  0x10   :  { %26 = dma.hbm_to_vmem [thread:$0]  %s472_s1, 128, %s21_s25, [#allocation3], %s374_s11, %s374_s11, %s375_s12  }
  0x11   :  { %371 = dma.done.wait [#allocation3], 128  }
  0x12   :  { %372 = vsyncadd [#allocation3], 4294967168  ;;  %v376_v0 = vmov 0.0   ;;  %vm377_vm0 = vmmov 0   ;;  %v340_v1 = vld [vmem:[#allocation2] sm:$0xff]   ;;  %vm58_vm1 = vcmask 130048  }
  0x13   :  { %305 = vmatprep.subr.bf16.mxu0 %v376_v0  ;;  %307 = vmatprep.mubr.msk.bf16.mxu0 %vm377_vm0, %v376_v0  ;;  %v41_v2 = vld [vmem:[%s471_s0] sm:$0xff]  ;;  %v342_v5 = vld [vmem:[%s474_s3 + $0x8] sm:$0xff]   ;;  %v343_v6 = vld [vmem:[%s474_s3 + $0x10] sm:$0xff]   ;;  %vm143_vm2 = vcmask 523264   ;;  %vm271_vm3 = vcmask 31744  }
  0x14   :  { %311 = vmatprep.subr.bf16.mxu1 %v376_v0  ;;  %319 = vmatprep.mubr.msk.bf16.mxu1 %vm377_vm0, %v376_v0  ;;  %v42_v3 = vpack.c.bf16 %v41_v2, %v41_v2  ;;  %v341_v4 = vld [vmem:[%s474_s3] sm:$0xff]   ;;  %v344_v7 = vld [vmem:[%s474_s3 + $0x18] sm:$0xff]   ;;  %v346_v9 = vld [vmem:[%s476_s5 + $0x8] sm:$0xff]  }
  0x15   :  { %306 = vmatpush3.bf16.msra.mxu0 %v340_v1  ;;  %312 = vmatpush3.bf16.msra.mxu1 %v341_v4  ;;  %v345_v8 = vld [vmem:[%s476_s5] sm:$0xff]   ;;  %v347_v18 = vld [vmem:[%s476_s5 + $0x10] sm:$0xff]   ;;  %v348_v19 = vld [vmem:[%s476_s5 + $0x18] sm:$0xff]  }
  0x16   :  { %323 = vmatprep.subr.bf16.mxu0 %v376_v0  ;;  %313 = vmatprep.subr.bf16.mxu1 %v376_v0  ;;  %v278_v10 = vld [vmem:[%s473_s2] ss:$0 sm:$0xff] }
  0x17   :  { %v281_v20 = vld [vmem:[%s475_s4] ss:$0 sm:$0xff] }
  0x18   :  { %308 = vmatmul.mubr.msk.bf16.vlgmr.msra.gmra.mrb[0].mxu0 %vm58_vm1, %v42_v3  ;;  %v287_v28 = vld [vmem:[%s477_s6] ss:$0 sm:$0xff] }
  0x19   :  { %331 = vmatprep.mubr.msk.bf16.mxu0 %vm377_vm0, %v376_v0  ;;  %314 = vmatpush3.bf16.msra.mxu1 %v342_v5 }
  0x1a   :  { %315 = vmatprep.subr.bf16.mxu1 %v376_v0  ;;  %324 = vmatpush3.bf16.msra.mxu0 %v345_v8 }
  0x1b   :  { %325 = vmatprep.subr.bf16.mxu0 %v376_v0 }
  0x1d   :  { %316 = vmatpush3.bf16.msra.mxu1 %v343_v6 }
  0x1e   :  { %317 = vmatprep.subr.bf16.mxu1 %v376_v0  ;;  %326 = vmatpush3.bf16.msra.mxu0 %v346_v9 }
  0x1f   :  { %327 = vmatprep.subr.bf16.mxu0 %v376_v0 }
  0x21   :  { %318 = vmatpush3.bf16.msra.mxu1 %v344_v7 }
  0x22   :  { %328 = vmatpush3.bf16.msra.mxu0 %v347_v18 }
  0x23   :  { %329 = vmatprep.subr.bf16.mxu0 %v376_v0 }
  0x26   :  { %330 = vmatpush3.bf16.msra.mxu0 %v348_v19 }
  0xeb   :  { %v96_v11 = vpop.f32.mrb[0].mxu0 }
  0xec   :  { %v97_v12 = vadd.f32 %v278_v10, %v96_v11  ;;  %v309_v13 = vpop.f32.mrb[1].mxu0 }
  0xed   :  { %v99_v14 = vpop.f32.mrb[2].mxu0 }
  0xee   :  { %v102_v15 = vmax.f32 %v97_v12, 0.0  ;;  %v310_v16 = vpop.f32.mrb[3].mxu0 }
  0xf0   :  { %v103_v17 = vpack.c.bf16 %v102_v15, %v102_v15 }
  0xf2   :  { %320 = vmatmul.mubr.msk.bf16.vlgmr.msra.gmra.mrb[0].mxu1 %vm143_vm2, %v103_v17 }
 0x1c5   :  { %v181_v21 = vpop.f32.mrb[0].mxu1 }
 0x1c6   :  { %v182_v22 = vadd.f32 %v281_v20, %v181_v21  ;;  %v321_v23 = vpop.f32.mrb[1].mxu1 }
 0x1c7   :  { %v184_v24 = vpop.f32.mrb[2].mxu1 }
 0x1c8   :  { %v187_v25 = vmax.f32 %v182_v22, 0.0  ;;  %v322_v26 = vpop.f32.mrb[3].mxu1 }
 0x1ca   :  { %v188_v27 = vpack.c.bf16 %v187_v25, %v187_v25 }
 0x1cc   :  { %332 = vmatmul.mubr.msk.bf16.vlgmr.msra.gmra.mrb[4].mxu0 %vm143_vm2, %v188_v27 }
 0x29f   :  { %v265_v29 = vpop.f32.mrb[4].mxu0 }
 0x2a0   :  { %v266_v30 = vadd.f32 %v287_v28, %v265_v29  ;;  %v333_v31 = vpop.f32.mrb[5].mxu0 }
 0x2a1   :  { %v268_v32 = vpop.f32.mrb[6].mxu0 }
 0x2a2   :  { %272 = vst.msk [vmem:[%s478_s7] sm:$0xff] %vm271_vm3, %v266_v30  ;;  %v334_v33 = vpop.f32.mrb[7].mxu0 }
 0x2a3   :  { %277 = vsyncpa [#allocation3], 1 }

</bundles_post_ra>
